<compile_context>
chip_gen: v7x
topology: tpu7x:2x2x1
jax: 0.10.0
libtpu: 0.0.40
codegen_flags: <defaults>
</compile_context>

<pallas_src>
import jax
import jax.numpy as jnp
from jax.experimental import pallas as pl
from jax.experimental.pallas import tpu as pltpu

# --------------------- small, module-consistent hyper-parameters ---------------------
IMG = 16            # img_size
PATCH = 8           # patch_size
IN_CHANS = 3        # in_chans (module default)
EMBED_DIM = 32      # embed_dim
B_VIDEOS = 2        # videos
T_FRAMES = 48       # frames per video (T is also hardcoded to 48 in the reference forward)
BT = B_VIDEOS * T_FRAMES
GRID_H = IMG // PATCH
GRID_W = IMG // PATCH
NUM_PATCHES = GRID_H * GRID_W

TILE_M = 128        # rows of the patch matrix per grid step
LANE = 128          # output padded up to a lane-dense multiple of 128


# ===================================== Pallas kernel =====================================

def _patch_embed_kernel(p_ref, w_ref, b_ref, o_ref):
    # (TILE_M, K) bf16 @ (K, DPAD) bf16 -> f32 accumulate on the MXU,
    # f32 bias add on the VPU, lane-dense (TILE_M, DPAD) f32 store.
    acc = jnp.dot(p_ref[...], w_ref[...], preferred_element_type=jnp.float32)
    o_ref[...] = acc + b_ref[...]


def patch_embed(x, conv_w, conv_b):
    """Pallas equivalent of PatchEmbed.forward.

    x       : (BT, C, H, W) float32   (BT = batch * frames, as TimeSformer calls it)
    conv_w  : (D, C, P, P)  float32   (PyTorch Conv2d weight layout)
    conv_b  : (D,)          float32
    returns : (tokens (BT, num_patches, D), T=48, W_out)  -- same tuple as the reference.
    """
    BT_, C, H, W = x.shape
    P = PATCH
    gh, gw = H // P, W // P
    Np = gh * gw
    D = conv_w.shape[0]
    K = C * P * P
    DPAD = ((D + LANE - 1) // LANE) * LANE            # lane-dense output width

    # Patch extraction (conv kernel==stride==P).  One XLA relayout pass over the activations
    # in HBM; negligible at these sizes (see TODO above for real shapes).
    patches = (
        x.reshape(BT_, C, gh, P, gw, P)
         .transpose(0, 2, 4, 1, 3, 5)                 # (BT, gh, gw, C, P, P)
         .reshape(BT_ * Np, K)
         .astype(jnp.bfloat16)                        # bf16 MXU inputs, f32 accumulate
    )

    # Weight -> (K, DPAD), bias -> (1, DPAD), zero-padded so kernel stores are lane-dense.
    w_mat = jnp.transpose(conv_w.reshape(D, K)).astype(jnp.bfloat16)      # (K, D)
    w_pad = jnp.zeros((K, DPAD), jnp.bfloat16).at[:, :D].set(w_mat)
    b_pad = jnp.zeros((1, DPAD), jnp.float32).at[:, :D].set(
        conv_b.astype(jnp.float32)[None, :])

    M = BT_ * Np
    grid_m = pl.cdiv(M, TILE_M)
    M_pad = grid_m * TILE_M
    if M_pad != M:
        patches = jnp.pad(patches, ((0, M_pad - M), (0, 0)))

    emb = pl.pallas_call(
        _patch_embed_kernel,
        out_shape=jax.ShapeDtypeStruct((M_pad, DPAD), jnp.float32),
        grid=(grid_m,),
        in_specs=[
            pl.BlockSpec((TILE_M, K), lambda i: (i, 0)),   # per-tile patch rows
            pl.BlockSpec((K, DPAD), lambda i: (0, 0)),     # weight: grid-invariant (VMEM-resident)
            pl.BlockSpec((1, DPAD), lambda i: (0, 0)),     # bias:   grid-invariant
        ],
        out_specs=pl.BlockSpec((TILE_M, DPAD), lambda i: (i, 0)),
        compiler_params=pltpu.CompilerParams(
            dimension_semantics=("parallel",),             # independent M tiles (2 TCs on v7x)
        ),
    )(patches, w_pad, b_pad)

    # flatten(2).transpose(1, 2) of the conv output == (BT, gh*gw, D) in i*gw + j row order,
    # which is exactly the row order of `patches`.
    tokens = emb[:M, :D].reshape(BT_, Np, D)
    return tokens, 48, gw                                  # reference returns (x, T, W)


# ========================================= main ==========================================

if __name__ == "__main__":
    key = jax.random.PRNGKey(0)
    kx, kw, kb = jax.random.split(key, 3)

    x = jax.random.normal(kx, (BT, IN_CHANS, IMG, IMG), jnp.float32)
    # Conv2d-style init (uniform in +-1/sqrt(fan_in)); exact distribution irrelevant here.
    fan_in = IN_CHANS * PATCH * PATCH
    bound = 1.0 / (fan_in ** 0.5)
    conv_w = jax.random.uniform(kw, (EMBED_DIM, IN_CHANS, PATCH, PATCH),
                                jnp.float32, -bound, bound)
    conv_b = jax.random.uniform(kb, (EMBED_DIM,), jnp.float32, -bound, bound)

    fwd = jax.jit(patch_embed)
    tokens, T, W_out = fwd(x, conv_w, conv_b)
    tokens = jax.block_until_ready(tokens)

    # Shape / sanity checks against the reference semantics.
    assert tokens.shape == (BT, NUM_PATCHES, EMBED_DIM), tokens.shape
    assert int(T) == 48
    assert int(W_out) == GRID_W
    assert bool(jnp.all(jnp.isfinite(tokens)))

    # Numerical check vs. a plain-JAX f32 / HIGHEST-precision reference of the same
    # conv-as-matmul (kernel runs bf16-in / f32-accumulate).
    ref_patches = (
        x.reshape(BT, IN_CHANS, GRID_H, PATCH, GRID_W, PATCH)
         .transpose(0, 2, 4, 1, 3, 5)
         .reshape(BT * NUM_PATCHES, IN_CHANS * PATCH * PATCH)
    )
    ref = (
        jnp.einsum("mk,kd->md", ref_patches,
                   jnp.transpose(conv_w.reshape(EMBED_DIM, -1)),
                   precision=jax.lax.Precision.HIGHEST)
        + conv_b[None, :]
    ).reshape(BT, NUM_PATCHES, EMBED_DIM)
    err = float(jnp.max(jnp.abs(tokens - ref)))
    assert err < 2e-2, err

    print("KERNEL_OK")
</pallas_src>

<mosaic_0001>
module attributes {stable_mosaic.version = 11 : i64} {
  func.func @_patch_embed_kernel(%arg0: i32, %arg1: memref<128x192xbf16, #tpu.memory_space<vmem>>, %arg2: memref<192x128xbf16, #tpu.memory_space<vmem>>, %arg3: memref<1x128xf32, #tpu.memory_space<vmem>>, %arg4: memref<128x128xf32, #tpu.memory_space<vmem>>) attributes {dimension_semantics = [#tpu.dimension_semantics<parallel>], iteration_bounds = array<i64: 3>, scalar_prefetch = 0 : i64, scratch_operands = 0 : i64, tpu.core_type = #tpu.core_type<tc>, window_params = [{transform_indices = @transform_0, window_bounds = array<i64: 128, 192>}, {pipeline_mode = #tpu.pipeline_mode<synchronous>, transform_indices = @transform_1, window_bounds = array<i64: 192, 128>}, {pipeline_mode = #tpu.pipeline_mode<synchronous>, transform_indices = @transform_2, window_bounds = array<i64: 1, 128>}, {transform_indices = @transform_3, window_bounds = array<i64: 128, 128>}]} {
    %c0 = arith.constant 0 : index
    %c0_0 = arith.constant 0 : index
    %0 = vector.load %arg1[%c0, %c0_0] : memref<128x192xbf16, #tpu.memory_space<vmem>>, vector<128x192xbf16>
    %c0_1 = arith.constant 0 : index
    %c0_2 = arith.constant 0 : index
    %1 = vector.load %arg2[%c0_1, %c0_2] : memref<192x128xbf16, #tpu.memory_space<vmem>>, vector<192x128xbf16>
    %cst = arith.constant dense<0.000000e+00> : vector<128x128xf32>
    %2 = tpu.matmul %0, %1, %cst {dimension_numbers = #tpu.dot_dimension_numbers<[1], [0], [0], [1], [0, 0, 1, 1], [], []>} : vector<128x192xbf16>, vector<192x128xbf16>, vector<128x128xf32> -> vector<128x128xf32>
    %c0_3 = arith.constant 0 : index
    %c0_4 = arith.constant 0 : index
    %3 = vector.load %arg3[%c0_3, %c0_4] : memref<1x128xf32, #tpu.memory_space<vmem>>, vector<1x128xf32>
    %4 = vector.broadcast %3 : vector<1x128xf32> to vector<128x128xf32>
    %5 = arith.addf %2, %4 : vector<128x128xf32>
    %c0_5 = arith.constant 0 : index
    %c0_6 = arith.constant 0 : index
    %6 = vector.load %arg4[%c0_5, %c0_6] : memref<128x128xf32, #tpu.memory_space<vmem>>, vector<128x128xf32>
    tpu.vector_store %arg4[%c0_5, %c0_6], %5 {strides = array<i32>} : memref<128x128xf32, #tpu.memory_space<vmem>>, vector<128x128xf32>,
    return
  }
  func.func @transform_0(%arg0: i32) -> (i32, i32) {
    %c0_i32 = arith.constant 0 : i32
    %c0_i32_0 = arith.constant 0 : i32
    return %arg0, %c0_i32 : i32, i32
  }
  func.func @transform_1(%arg0: i32) -> (i32, i32) {
    %c0_i32 = arith.constant 0 : i32
    %c0_i32_0 = arith.constant 0 : i32
    %c0_i32_1 = arith.constant 0 : i32
    return %c0_i32, %c0_i32_0 : i32, i32
  }
  func.func @transform_2(%arg0: i32) -> (i32, i32) {
    %c0_i32 = arith.constant 0 : i32
    %c0_i32_0 = arith.constant 0 : i32
    %c0_i32_1 = arith.constant 0 : i32
    return %c0_i32, %c0_i32_0 : i32, i32
  }
  func.func @transform_3(%arg0: i32) -> (i32, i32) {
    %c0_i32 = arith.constant 0 : i32
    %c0_i32_0 = arith.constant 0 : i32
    return %arg0, %c0_i32 : i32, i32
  }
}

</mosaic_0001>

<bundles_post_ra>
// kernel: patch_embed.1
= control target key start
LH: loop header
LB: loop body
LE: loop exit
PB: predicated region body
PF: predicated region fallthrough
CT: control target
= control target key end

     0   :  { %s711_s12 = smov 0   ;;  %s842_s0 = inlined_call_operand.vmem [shape: bf16[384,192], index: 0, kind: input, shape index: {}]   ;;  %s843_s1 = inlined_call_operand.vmem [shape: bf16[192,128], index: 1, kind: input, shape index: {}]   ;;  %s844_s2 = inlined_call_operand.vmem [shape: f32[1,128], index: 2, kind: input, shape index: {}]   ;;  %s845_s3 = inlined_call_operand.vmem [shape: f32[384,128], index: 3, kind: output, shape index: {}]  }
   0x1 LB: > { %s563_s13 = sadd.s32 4294967295, %s688_s12   ;;  %p567_p0 = scmp.ge.s32.totalorder %s688_s12, 1  ;;  %s688_s12 = sphi %s711_s12, %s13_s12  }
   0x2   : > { %p139_p1 = scmp.lt.s32.totalorder %s688_s12, 4 }
   0x4   : > { %p140_p2 = pnand %p567_p0, %p139_p1 }
   0x5   : > { %v646_v0 = vld [vmem:[%s843_s1] sm:$0xff] (!%p140_p2)   ;;  %v690_v1 = vmov (!%p140_p2), 0   ;;  %s568_s16 = sshll.u32 (!%p140_p2), %s563_s13, 4  ;;  %v647_v2 = vld [vmem:[%s843_s1 + $0x8] sm:$0xff] (!%p140_p2)   ;;  %v648_v3 = vld [vmem:[%s843_s1 + $0x10] sm:$0xff] (!%p140_p2)   ;;  %vm369_vm0 = vcmask (!%p140_p2), 523264  }
   0x6   : > { %143 = sbr.rel (%p140_p2) target bundleno = 295 (0x127), region = 32  ;;  %394 = vmatprep.subr.bf16.mxu0 (!%p140_p2), %v690_v1  ;;  %613 = vmatprep.subr.bf16.mxu1 (!%p140_p2), %v690_v1  ;;  %p165_p3 = scmp.lt.s32.totalorder (!%p140_p2), %s568_s16, 47  ;;  %v649_v4 = vld [vmem:[%s843_s1 + $0x18] sm:$0xff] (!%p140_p2)   ;;  %v650_v6 = vld [vmem:[%s843_s1 + $0x20] sm:$0xff] (!%p140_p2)   ;;  %v651_v8 = vld [vmem:[%s843_s1 + $0x28] sm:$0xff] (!%p140_p2)  }
   0x7   : > { %395 = vmatpush1.bf16.msra.mxu0 (!%p140_p2), %v646_v0  ;;  %625 = vmatpush1.bf16.msra.mxu1 (!%p140_p2), %v646_v0  ;;  %v652_v9 = vld [vmem:[%s843_s1 + $0x30] sm:$0xff] (!%p140_p2)   ;;  %v653_v10 = vld [vmem:[%s843_s1 + $0x38] sm:$0xff] (!%p140_p2)   ;;  %v654_v11 = vld [vmem:[%s843_s1 + $0x40] sm:$0xff] (!%p140_p2)  }
   0x8   : > { %396 = vmatprep.subr.bf16.mxu0 (!%p140_p2), %v690_v1  ;;  %614 = vmatprep.subr.bf16.mxu1 (!%p140_p2), %v690_v1  ;;  %v655_v12 = vld [vmem:[%s843_s1 + $0x48] sm:$0xff] (!%p140_p2)   ;;  %v656_v13 = vld [vmem:[%s843_s1 + $0x50] sm:$0xff] (!%p140_p2)   ;;  %v657_v14 = vld [vmem:[%s843_s1 + $0x58] sm:$0xff] (!%p140_p2)  }
   0x9   : > { %v573_v29 = vld [vmem:[%s844_s2] ss:$0 sm:$0xff] (!%p140_p2) }
   0xb   : > { %397 = vmatpush1.bf16.msra.mxu0 (!%p140_p2), %v647_v2  ;;  %626 = vmatpush1.bf16.msra.mxu1 (!%p140_p2), %v647_v2 }
   0xc   : > { %398 = vmatprep.subr.bf16.mxu0 (!%p140_p2), %v690_v1  ;;  %615 = vmatprep.subr.bf16.mxu1 (!%p140_p2), %v690_v1 }
   0xd   : > { %s847_s16 = smov (!%p165_p3, %s568_s16), 47 }
   0xe   : > { %s612_s21 = sshll.u32 %s847_s16, 3 }
   0xf   : > { %399 = vmatpush1.bf16.msra.mxu0 %v648_v3  ;;  %627 = vmatpush1.bf16.msra.mxu1 %v648_v3  ;;  %s745_s26 = scalar_lea.vmem %s842_s0, %s612_s21  ;;  %s821_s23 = scalar_lea.vmem %s845_s3, %s612_s21 }
  0x10   : > { %400 = vmatprep.subr.bf16.mxu0 %v690_v1  ;;  %616 = vmatprep.subr.bf16.mxu1 %v690_v1  ;;  %v660_v5 = vld [vmem:[%s745_s26 + $0x4] ss:$8 sps:$4 sm:$0xff]   ;;  %v658_v15 = vld [vmem:[%s745_s26] ss:$8 sps:$4 sm:$0xff]   ;;  %v664_v17 = vld [vmem:[%s745_s26 + $0x14] ss:$8 sps:$4 sm:$0xff]  }
  0x11   : > { %v663_v7 = vld [vmem:[%s745_s26 + $0x44] ss:$8 sps:$4 sm:$0xff]   ;;  %602 = vmatprep.mubr.msk.bf16.mxu0 %vm369_vm0, %v660_v5  ;;  %v661_v16 = vld [vmem:[%s745_s26 + $0x40] ss:$8 sps:$4 sm:$0xff]   ;;  %v666_v18 = vld [vmem:[%s745_s26 + $0x54] ss:$8 sps:$4 sm:$0xff]  }
  0x12   : > { %606 = vmatprep.mubr.msk.bf16.mxu1 %vm369_vm0, %v663_v7  ;;  %v668_v19 = vld [vmem:[%s745_s26 + $0x10] ss:$8 sps:$4 sm:$0xff]   ;;  %v670_v21 = vld [vmem:[%s745_s26 + $0x24] ss:$8 sps:$4 sm:$0xff]   ;;  %v674_v23 = vld [vmem:[%s745_s26 + $0x20] ss:$8 sps:$4 sm:$0xff]  }
  0x13   : > { %401 = vmatpush1.bf16.msra.mxu0 %v649_v4  ;;  %628 = vmatpush1.bf16.msra.mxu1 %v649_v4  ;;  %v669_v20 = vld [vmem:[%s745_s26 + $0x50] ss:$8 sps:$4 sm:$0xff]   ;;  %v672_v22 = vld [vmem:[%s745_s26 + $0x64] ss:$8 sps:$4 sm:$0xff]   ;;  %v675_v24 = vld [vmem:[%s745_s26 + $0x60] ss:$8 sps:$4 sm:$0xff]  }
  0x14   : > { %402 = vmatprep.subr.bf16.mxu0 %v690_v1  ;;  %617 = vmatprep.subr.bf16.mxu1 %v690_v1  ;;  %v676_v25 = vld [vmem:[%s745_s26 + $0x34] ss:$8 sps:$4 sm:$0xff]   ;;  %v680_v27 = vld [vmem:[%s745_s26 + $0x30] ss:$8 sps:$4 sm:$0xff]  }
  0x15   : > { %v678_v26 = vld [vmem:[%s745_s26 + $0x74] ss:$8 sps:$4 sm:$0xff]   ;;  %v681_v28 = vld [vmem:[%s745_s26 + $0x70] ss:$8 sps:$4 sm:$0xff]  }
  0x17   : > { %403 = vmatpush1.bf16.msra.mxu0 %v650_v6  ;;  %629 = vmatpush1.bf16.msra.mxu1 %v650_v6 }
  0x18   : > { %404 = vmatprep.subr.bf16.mxu0 %v690_v1  ;;  %618 = vmatprep.subr.bf16.mxu1 %v690_v1 }
  0x1b   : > { %405 = vmatpush1.bf16.msra.mxu0 %v651_v8  ;;  %630 = vmatpush1.bf16.msra.mxu1 %v651_v8 }
  0x1c   : > { %406 = vmatprep.subr.bf16.mxu0 %v690_v1  ;;  %619 = vmatprep.subr.bf16.mxu1 %v690_v1 }
  0x1f   : > { %407 = vmatpush1.bf16.msra.mxu0 %v652_v9  ;;  %631 = vmatpush1.bf16.msra.mxu1 %v652_v9 }
  0x20   : > { %408 = vmatprep.subr.bf16.mxu0 %v690_v1  ;;  %620 = vmatprep.subr.bf16.mxu1 %v690_v1 }
  0x23   : > { %409 = vmatpush1.bf16.msra.mxu0 %v653_v10  ;;  %632 = vmatpush1.bf16.msra.mxu1 %v653_v10 }
  0x24   : > { %410 = vmatprep.subr.bf16.mxu0 %v690_v1  ;;  %621 = vmatprep.subr.bf16.mxu1 %v690_v1 }
  0x27   : > { %411 = vmatpush1.bf16.msra.mxu0 %v654_v11  ;;  %633 = vmatpush1.bf16.msra.mxu1 %v654_v11 }
  0x28   : > { %412 = vmatprep.subr.bf16.mxu0 %v690_v1  ;;  %622 = vmatprep.subr.bf16.mxu1 %v690_v1 }
  0x2b   : > { %413 = vmatpush1.bf16.msra.mxu0 %v655_v12  ;;  %634 = vmatpush1.bf16.msra.mxu1 %v655_v12 }
  0x2c   : > { %414 = vmatprep.subr.bf16.mxu0 %v690_v1  ;;  %623 = vmatprep.subr.bf16.mxu1 %v690_v1 }
  0x2f   : > { %415 = vmatpush1.bf16.msra.mxu0 %v656_v13  ;;  %635 = vmatpush1.bf16.msra.mxu1 %v656_v13 }
  0x30   : > { %416 = vmatprep.subr.bf16.mxu0 %v690_v1  ;;  %624 = vmatprep.subr.bf16.mxu1 %v690_v1 }
  0x33   : > { %417 = vmatpush1.bf16.msra.mxu0 %v657_v14  ;;  %636 = vmatpush1.bf16.msra.mxu1 %v657_v14 }
  0x36   : > { %427 = vmatmul.mubr.bf16.vlgmr.msra.gmra.mrb[0].mxu0 %v658_v15  ;;  %459 = vmatmul.mubr.bf16.vlgmr.msra.gmra.mrb[0].mxu1 %v661_v16 }
  0x37   : > { %603 = vmatprep.mubr.msk.bf16.mxu0 %vm369_vm0, %v664_v17  ;;  %607 = vmatprep.mubr.msk.bf16.mxu1 %vm369_vm0, %v666_v18 }
  0x3e   : > { %435 = vmatmul.mubr.bf16.gmra.mrb[4].mxu0 %v668_v19  ;;  %467 = vmatmul.mubr.bf16.gmra.mrb[4].mxu1 %v669_v20 }
  0x3f   : > { %604 = vmatprep.mubr.msk.bf16.mxu0 %vm369_vm0, %v670_v21  ;;  %608 = vmatprep.mubr.msk.bf16.mxu1 %vm369_vm0, %v672_v22 }
  0x46   : > { %443 = vmatmul.mubr.bf16.gmra.mrb[8].mxu0 %v674_v23  ;;  %475 = vmatmul.mubr.bf16.gmra.mrb[8].mxu1 %v675_v24 }
  0x47   : > { %605 = vmatprep.mubr.msk.bf16.mxu0 %vm369_vm0, %v676_v25  ;;  %609 = vmatprep.mubr.msk.bf16.mxu1 %vm369_vm0, %v678_v26 }
  0x4e   : > { %451 = vmatmul.mubr.bf16.gmra.mrb[12].mxu0 %v680_v27  ;;  %483 = vmatmul.mubr.bf16.gmra.mrb[12].mxu1 %v681_v28 }
 0x109   : > { %v428_v30 = vpop.f32.mrb[0].mxu0  ;;  %v460_v31 = vpop.f32.mrb[0].mxu1 }
 0x10a   : > { %v429_v32 = vadd.f32 %v573_v29, %v428_v30  ;;  %v461_v33 = vadd.f32 %v573_v29, %v460_v31  ;;  %v430_v34 = vpop.f32.mrb[1].mxu0  ;;  %v462_v35 = vpop.f32.mrb[1].mxu1 }
 0x10b   : > { %v431_v36 = vpop.f32.mrb[2].mxu0  ;;  %v463_v37 = vpop.f32.mrb[2].mxu1 }
 0x10c   : > { %491 = vst [vmem:[%s821_s23] sm:$0xff] %v429_v32  ;;  %499 = vst [vmem:[%s821_s23 + $0x40] sm:$0xff] %v461_v33  ;;  %v432_v38 = vadd.f32 %v573_v29, %v431_v36  ;;  %v464_v39 = vadd.f32 %v573_v29, %v463_v37  ;;  %v433_v40 = vpop.f32.mrb[3].mxu0  ;;  %v465_v41 = vpop.f32.mrb[3].mxu1 }
 0x10e   : > { %492 = vst [vmem:[%s821_s23 + $0x8] sm:$0xff] %v432_v38  ;;  %500 = vst [vmem:[%s821_s23 + $0x48] sm:$0xff] %v464_v39 }
 0x111   : > { %v436_v42 = vpop.f32.mrb[4].mxu0  ;;  %v468_v43 = vpop.f32.mrb[4].mxu1 }
 0x112   : > { %v437_v44 = vadd.f32 %v573_v29, %v436_v42  ;;  %v469_v45 = vadd.f32 %v573_v29, %v468_v43  ;;  %v438_v46 = vpop.f32.mrb[5].mxu0  ;;  %v470_v47 = vpop.f32.mrb[5].mxu1 }
 0x113   : > { %v439_v48 = vpop.f32.mrb[6].mxu0  ;;  %v471_v49 = vpop.f32.mrb[6].mxu1 }
 0x114   : > { %493 = vst [vmem:[%s821_s23 + $0x10] sm:$0xff] %v437_v44  ;;  %501 = vst [vmem:[%s821_s23 + $0x50] sm:$0xff] %v469_v45  ;;  %v440_v50 = vadd.f32 %v573_v29, %v439_v48  ;;  %v472_v51 = vadd.f32 %v573_v29, %v471_v49  ;;  %v441_v52 = vpop.f32.mrb[7].mxu0  ;;  %v473_v53 = vpop.f32.mrb[7].mxu1 }
 0x116   : > { %494 = vst [vmem:[%s821_s23 + $0x18] sm:$0xff] %v440_v50  ;;  %502 = vst [vmem:[%s821_s23 + $0x58] sm:$0xff] %v472_v51 }
 0x119   : > { %v444_v54 = vpop.f32.mrb[8].mxu0  ;;  %v476_v55 = vpop.f32.mrb[8].mxu1 }
 0x11a   : > { %v445_v56 = vadd.f32 %v573_v29, %v444_v54  ;;  %v477_v57 = vadd.f32 %v573_v29, %v476_v55  ;;  %v446_v58 = vpop.f32.mrb[9].mxu0  ;;  %v478_v59 = vpop.f32.mrb[9].mxu1 }
 0x11b   : > { %v447_v60 = vpop.f32.mrb[10].mxu0  ;;  %v479_v61 = vpop.f32.mrb[10].mxu1 }
 0x11c   : > { %495 = vst [vmem:[%s821_s23 + $0x20] sm:$0xff] %v445_v56  ;;  %503 = vst [vmem:[%s821_s23 + $0x60] sm:$0xff] %v477_v57  ;;  %v448_v62 = vadd.f32 %v573_v29, %v447_v60  ;;  %v480_v63 = vadd.f32 %v573_v29, %v479_v61  ;;  %v449_v0 = vpop.f32.mrb[11].mxu0  ;;  %v481_v1 = vpop.f32.mrb[11].mxu1 }
 0x11e   : > { %496 = vst [vmem:[%s821_s23 + $0x28] sm:$0xff] %v448_v62  ;;  %504 = vst [vmem:[%s821_s23 + $0x68] sm:$0xff] %v480_v63 }
 0x121   : > { %v452_v2 = vpop.f32.mrb[12].mxu0  ;;  %v484_v3 = vpop.f32.mrb[12].mxu1 }
 0x122   : > { %v453_v4 = vadd.f32 %v573_v29, %v452_v2  ;;  %v485_v5 = vadd.f32 %v573_v29, %v484_v3  ;;  %v454_v6 = vpop.f32.mrb[13].mxu0  ;;  %v486_v7 = vpop.f32.mrb[13].mxu1 }
 0x123   : > { %v455_v8 = vpop.f32.mrb[14].mxu0  ;;  %v487_v9 = vpop.f32.mrb[14].mxu1 }
 0x124   : > { %497 = vst [vmem:[%s821_s23 + $0x30] sm:$0xff] %v453_v4  ;;  %505 = vst [vmem:[%s821_s23 + $0x70] sm:$0xff] %v485_v5  ;;  %v456_v10 = vadd.f32 %v573_v29, %v455_v8  ;;  %v488_v11 = vadd.f32 %v573_v29, %v487_v9  ;;  %v457_v12 = vpop.f32.mrb[15].mxu0  ;;  %v489_v13 = vpop.f32.mrb[15].mxu1 }
 0x126   : > { %498 = vst [vmem:[%s821_s23 + $0x38] sm:$0xff] %v456_v10  ;;  %506 = vst [vmem:[%s821_s23 + $0x78] sm:$0xff] %v488_v11 }
 0x127 PF: > { %s13_s12 = sadd.s32 1, %s688_s12  }
 0x128   : > { %p10_p4 = scmp.ge.s32.totalorder %s13_s12, 5  }
 0x12a   :  { %12 = sbr.rel (!%p10_p4) target bundleno = 1 (0x1), region = 62 }

</bundles_post_ra>
